<compile_context>
chip_gen: v6e
topology: v6e:2x2x1
jax: 0.10.0
libtpu: 0.0.40
codegen_flags: <defaults>
</compile_context>

<pallas_src>
import functools
from typing import NamedTuple, Optional

import jax
import jax.numpy as jnp
from jax.experimental import pallas as pl
from jax.experimental.pallas import tpu as pltpu


def _round_up(a: int, b: int) -> int:
    return ((a + b - 1) // b) * b


# --------------------------------------------------------------------------
# Kernels
# --------------------------------------------------------------------------
def _dense_kernel_f32out(x_ref, w_ref, b_ref, o_ref):
    """Accumulate directly into the resident f32 output block."""
    # x_ref: (TM, TK), w_ref: (TK, TN), b_ref: (1, TN), o_ref: (TM, TN) f32
    k = pl.program_id(2)

    @pl.when(k == 0)
    def _():
        o_ref[...] = jnp.zeros_like(o_ref)

    o_ref[...] += jnp.dot(x_ref[...], w_ref[...],
                          preferred_element_type=jnp.float32)

    @pl.when(k == pl.num_programs(2) - 1)
    def _():
        o_ref[...] = jnp.tanh(o_ref[...] + b_ref[...])


def _dense_kernel_acc(x_ref, w_ref, b_ref, o_ref, acc_ref):
    """Scratch-accumulator variant for non-f32 output dtypes."""
    k = pl.program_id(2)

    @pl.when(k == 0)
    def _():
        acc_ref[...] = jnp.zeros_like(acc_ref)

    acc_ref[...] += jnp.dot(x_ref[...], w_ref[...],
                            preferred_element_type=jnp.float32)

    @pl.when(k == pl.num_programs(2) - 1)
    def _():
        o_ref[...] = jnp.tanh(acc_ref[...] + b_ref[...]).astype(o_ref.dtype)


# --------------------------------------------------------------------------
# Parameter preparation (done once, outside the per-call hot path)
# --------------------------------------------------------------------------
class DenseParams(NamedTuple):
    w_t: jax.Array   # (Kp, Np) weight, transposed + zero-padded, compute dtype
    b: jax.Array     # (1, Np) bias, zero-padded, float32
    n: int           # logical out_features
    k: int           # logical in_features
    tn: int          # N tile (multiple of 128, divides Np)
    tk: int          # K tile (multiple of 128, divides Kp)


def prepare_dense_params(weight, bias, *, max_tile_n: int = 512,
                         max_tile_k: int = 512,
                         compute_dtype: Optional[jnp.dtype] = None
                         ) -> DenseParams:
    """Transpose / pad PyTorch-layout (N, K) weight once at model-load time."""
    n, k = weight.shape
    assert bias.shape == (n,), bias.shape

    tn = _round_up(min(max_tile_n, _round_up(n, 128)), 128)
    tk = _round_up(min(max_tile_k, _round_up(k, 128)), 128)
    np_, kp = _round_up(n, tn), _round_up(k, tk)

    w_t = jnp.transpose(weight)                       # (K, N)
    if (kp, np_) != (k, n):
        w_t = jnp.pad(w_t, ((0, kp - k), (0, np_ - n)))
    if compute_dtype is not None:
        w_t = w_t.astype(compute_dtype)               # numerics-visible change

    b = bias.astype(jnp.float32)
    if np_ != n:
        b = jnp.pad(b, (0, np_ - n))
    b = b.reshape(1, np_)

    return DenseParams(w_t=w_t, b=b, n=n, k=k, tn=tn, tk=tk)


# --------------------------------------------------------------------------
# Forward
# --------------------------------------------------------------------------
def dense_forward(x, params: DenseParams, *, max_tile_m: int = 512):
    """y = tanh(x @ W.T + b) with prepared (pre-transposed/padded) params."""
    m, k = x.shape
    assert k == params.k, (k, params.k)

    kp, np_ = params.w_t.shape
    tn, tk = params.tn, params.tk
    out_dtype = x.dtype

    # M tile: as large as possible (single M pass → W read exactly once).
    tm = _round_up(min(max_tile_m, _round_up(m, 8)), 8)
    mp = _round_up(m, tm)
    m_tiles = mp // tm

    # Guarantee >=2 blocks along a parallel axis so v7x's 2 TCs both get work.
    if m_tiles == 1:
        while np_ // tn < 2 and tn > 128:
            tn //= 2

    # Only x is padded per call (small); W/bias were padded at load time.
    x_c = x if params.w_t.dtype == x.dtype else x.astype(params.w_t.dtype)
    if (mp, kp) != (m, k):
        x_c = jnp.pad(x_c, ((0, mp - m), (0, kp - k)))

    grid = (m_tiles, np_ // tn, kp // tk)
    use_scratch = out_dtype != jnp.float32
    kernel = _dense_kernel_acc if use_scratch else _dense_kernel_f32out
    scratch = [pltpu.VMEM((tm, tn), jnp.float32)] if use_scratch else []

    ix = jnp.dtype(x_c.dtype).itemsize
    iw = jnp.dtype(params.w_t.dtype).itemsize
    io = jnp.dtype(out_dtype).itemsize
    vmem_need = (2 * tm * tk * ix + 2 * tk * tn * iw + 2 * tm * tn * io
                 + 2 * tn * 4 + (tm * tn * 4 if use_scratch else 0))
    # 48 MiB ceiling is safe on every generation (incl. v7x's 64 MiB VMEM).
    vmem_limit = min(max(2 * vmem_need, 32 * 1024 * 1024), 48 * 1024 * 1024)

    out_p = pl.pallas_call(
        kernel,
        out_shape=jax.ShapeDtypeStruct((mp, np_), out_dtype),
        grid_spec=pltpu.PrefetchScalarGridSpec(
            num_scalar_prefetch=0,
            grid=grid,
            in_specs=[
                pl.BlockSpec((tm, tk), lambda i, j, kk: (i, kk)),   # x  (M, K)
                pl.BlockSpec((tk, tn), lambda i, j, kk: (kk, j)),   # Wt (K, N)
                pl.BlockSpec((1, tn), lambda i, j, kk: (0, j)),     # bias
            ],
            out_specs=pl.BlockSpec((tm, tn), lambda i, j, kk: (i, j)),
            scratch_shapes=scratch,
        ),
        compiler_params=pltpu.CompilerParams(
            dimension_semantics=("parallel", "parallel", "arbitrary"),
            vmem_limit_bytes=vmem_limit,
        ),
    )(x_c, params.w_t, params.b)

    if mp == m and np_ == params.n:
        return out_p
    return out_p[:m, :params.n]


def dense_forward_raw(x, weight, bias, **kw):
    """Convenience: prepare + forward (weight in PyTorch (N, K) layout)."""
    prep_kw = {kk: kw.pop(kk) for kk in ("max_tile_n", "max_tile_k",
                                         "compute_dtype") if kk in kw}
    return dense_forward(x, prepare_dense_params(weight, bias, **prep_kw), **kw)


def dense_module_forward(features, params: DenseParams):
    """Mirrors Dense.forward: updates the dict and returns it."""
    features = dict(features)
    features["segment_embedding"] = dense_forward(
        features["segment_embedding"], params)
    return features


# --------------------------------------------------------------------------
# Self-test
# --------------------------------------------------------------------------
if __name__ == "__main__":
    key = jax.random.PRNGKey(0)
    k_x, k_w, k_b, k_x2, k_w2, k_b2 = jax.random.split(key, 6)

    # --- primary check: small shapes matching the module's usage ------------
    batch, in_features, out_features = 8, 32, 32

    x = jax.random.normal(k_x, (batch, in_features), dtype=jnp.float32)
    bound = 1.0 / (in_features ** 0.5)
    weight = jax.random.uniform(k_w, (out_features, in_features),
                                minval=-bound, maxval=bound, dtype=jnp.float32)
    bias = jax.random.uniform(k_b, (out_features,),
                              minval=-bound, maxval=bound, dtype=jnp.float32)

    params = prepare_dense_params(weight, bias)   # done once, off hot path
    features = {"segment_embedding": x}
    out = dense_module_forward(features, params)
    y = out["segment_embedding"]
    jax.block_until_ready(y)

    y_ref = jnp.tanh(x @ weight.T + bias)
    assert y.shape == (batch, out_features)
    assert jnp.allclose(y, y_ref, atol=1e-5, rtol=1e-5)

    # --- secondary check: ragged shapes, multi-tile M/K accumulation --------
    M2, K2, N2 = 48, 200, 96
    x2 = jax.random.normal(k_x2, (M2, K2), dtype=jnp.float32)
    b2d = 1.0 / (K2 ** 0.5)
    w2 = jax.random.uniform(k_w2, (N2, K2), minval=-b2d, maxval=b2d,
                            dtype=jnp.float32)
    b2 = jax.random.uniform(k_b2, (N2,), minval=-b2d, maxval=b2d,
                            dtype=jnp.float32)

    y2 = dense_forward_raw(x2, w2, b2, max_tile_m=16, max_tile_n=128,
                           max_tile_k=128)
    jax.block_until_ready(y2)

    y2_ref = jnp.tanh(
        jax.lax.dot_general(x2, w2, (((1,), (1,)), ((), ())),
                            precision=jax.lax.Precision.HIGHEST) + b2)
    assert y2.shape == (M2, N2)
    assert jnp.allclose(y2, y2_ref, atol=1e-4, rtol=1e-4)

    # --- optional bf16-compute path (numerics-visible; looser tolerance) ----
    y3 = dense_forward_raw(x2, w2, b2, compute_dtype=jnp.bfloat16)
    jax.block_until_ready(y3)
    assert jnp.allclose(y3, y2_ref, atol=3e-2, rtol=3e-2)

    print("KERNEL_OK")
</pallas_src>

<mosaic_0001>
module attributes {stable_mosaic.version = 11 : i64} {
  func.func @_dense_kernel_f32out(%arg0: i32, %arg1: i32, %arg2: i32, %arg3: memref<8x128xf32, #tpu.memory_space<vmem>>, %arg4: memref<128x128xf32, #tpu.memory_space<vmem>>, %arg5: memref<1x128xf32, #tpu.memory_space<vmem>>, %arg6: memref<8x128xf32, #tpu.memory_space<vmem>>) attributes {dimension_semantics = [#tpu.dimension_semantics<parallel>, #tpu.dimension_semantics<parallel>, #tpu.dimension_semantics<arbitrary>], iteration_bounds = array<i64: 1, 1, 1>, scalar_prefetch = 0 : i64, scratch_operands = 0 : i64, tpu.core_type = #tpu.core_type<tc>, window_params = [{transform_indices = @transform_0, window_bounds = array<i64: 8, 128>}, {transform_indices = @transform_1, window_bounds = array<i64: 128, 128>}, {transform_indices = @transform_2, window_bounds = array<i64: 1, 128>}, {transform_indices = @transform_3, window_bounds = array<i64: 8, 128>}]} {
    %c0_i32 = arith.constant 0 : i32
    %0 = arith.cmpi eq, %arg2, %c0_i32 : i32
    %1 = arith.extui %0 : i1 to i32
    %c0_i32_0 = arith.constant 0 : i32
    %2 = arith.cmpi ne, %1, %c0_i32_0 : i32
    scf.if %2 {
      %cst_10 = arith.constant 0.000000e+00 : f32
      %12 = vector.broadcast %cst_10 : f32 to vector<8x128xf32>
      %c0_11 = arith.constant 0 : index
      %c0_12 = arith.constant 0 : index
      %13 = vector.load %arg6[%c0_11, %c0_12] : memref<8x128xf32, #tpu.memory_space<vmem>>, vector<8x128xf32>
      tpu.vector_store %arg6[%c0_11, %c0_12], %12 {strides = array<i32>} : memref<8x128xf32, #tpu.memory_space<vmem>>, vector<8x128xf32>,
    } else {
    }
    %c0 = arith.constant 0 : index
    %c0_1 = arith.constant 0 : index
    %3 = vector.load %arg6[%c0, %c0_1] : memref<8x128xf32, #tpu.memory_space<vmem>>, vector<8x128xf32>
    %c0_2 = arith.constant 0 : index
    %c0_3 = arith.constant 0 : index
    %4 = vector.load %arg3[%c0_2, %c0_3] : memref<8x128xf32, #tpu.memory_space<vmem>>, vector<8x128xf32>
    %c0_4 = arith.constant 0 : index
    %c0_5 = arith.constant 0 : index
    %5 = vector.load %arg4[%c0_4, %c0_5] : memref<128x128xf32, #tpu.memory_space<vmem>>, vector<128x128xf32>
    %cst = arith.constant dense<0.000000e+00> : vector<8x128xf32>
    %6 = tpu.matmul %4, %5, %cst {dimension_numbers = #tpu.dot_dimension_numbers<[1], [0], [0], [1], [0, 0, 1, 1], [], []>} : vector<8x128xf32>, vector<128x128xf32>, vector<8x128xf32> -> vector<8x128xf32>
    %7 = arith.addf %3, %6 : vector<8x128xf32>
    %c0_6 = arith.constant 0 : index
    %c0_7 = arith.constant 0 : index
    %8 = vector.load %arg6[%c0_6, %c0_7] : memref<8x128xf32, #tpu.memory_space<vmem>>, vector<8x128xf32>
    tpu.vector_store %arg6[%c0_6, %c0_7], %7 {strides = array<i32>} : memref<8x128xf32, #tpu.memory_space<vmem>>, vector<8x128xf32>,
    %c0_i32_8 = arith.constant 0 : i32
    %9 = arith.cmpi eq, %arg2, %c0_i32_8 : i32
    %10 = arith.extui %9 : i1 to i32
    %c0_i32_9 = arith.constant 0 : i32
    %11 = arith.cmpi ne, %10, %c0_i32_9 : i32
    scf.if %11 {
      %c0_10 = arith.constant 0 : index
      %c0_11 = arith.constant 0 : index
      %12 = vector.load %arg6[%c0_10, %c0_11] : memref<8x128xf32, #tpu.memory_space<vmem>>, vector<8x128xf32>
      %c0_12 = arith.constant 0 : index
      %c0_13 = arith.constant 0 : index
      %13 = vector.load %arg5[%c0_12, %c0_13] : memref<1x128xf32, #tpu.memory_space<vmem>>, vector<1x128xf32>
      %14 = vector.broadcast %13 : vector<1x128xf32> to vector<8x128xf32>
      %15 = arith.addf %12, %14 : vector<8x128xf32>
      %16 = math.tanh %15 : vector<8x128xf32>
      %c0_14 = arith.constant 0 : index
      %c0_15 = arith.constant 0 : index
      %17 = vector.load %arg6[%c0_14, %c0_15] : memref<8x128xf32, #tpu.memory_space<vmem>>, vector<8x128xf32>
      tpu.vector_store %arg6[%c0_14, %c0_15], %16 {strides = array<i32>} : memref<8x128xf32, #tpu.memory_space<vmem>>, vector<8x128xf32>,
    } else {
    }
    return
  }
  func.func @transform_0(%arg0: i32, %arg1: i32, %arg2: i32) -> (i32, i32) {
    %c0_i32 = arith.constant 0 : i32
    return %arg0, %arg2 : i32, i32
  }
  func.func @transform_1(%arg0: i32, %arg1: i32, %arg2: i32) -> (i32, i32) {
    %c0_i32 = arith.constant 0 : i32
    return %arg2, %arg1 : i32, i32
  }
  func.func @transform_2(%arg0: i32, %arg1: i32, %arg2: i32) -> (i32, i32) {
    %c0_i32 = arith.constant 0 : i32
    %c0_i32_0 = arith.constant 0 : i32
    return %c0_i32, %arg1 : i32, i32
  }
  func.func @transform_3(%arg0: i32, %arg1: i32, %arg2: i32) -> (i32, i32) {
    %c0_i32 = arith.constant 0 : i32
    return %arg0, %arg1 : i32, i32
  }
}

</mosaic_0001>

<bundles_post_ra>
// kernel: tpu_custom_call.1
= control target key start
LH: loop header
LB: loop body
LE: loop exit
PB: predicated region body
PF: predicated region fallthrough
CT: control target
= control target key end

     0   :  { %8 = vsyncpa [#allocation3], 0  ;;  %s333_s0 = inlined_call_operand.hbm [shape: f32[8,128], index: 0, kind: input, shape index: {}]   ;;  %s334_s1 = inlined_call_operand.hbm [shape: f32[128,128], index: 1, kind: input, shape index: {}]   ;;  %s335_s2 = inlined_call_operand.vmem [shape: f32[1,128], index: 2, kind: input, shape index: {}]   ;;  %s336_s3 = inlined_call_operand.hbm [shape: f32[8,128], index: 3, kind: output, shape index: {}]  }
   0x1   :  { %9 = vsyncpa [#allocation6], 0 }
   0x2   :  { %10 = vsyncpa [#allocation4], 0  ;;  %s294_s12 = smov [#allocation2]   ;;  %s295_s14 = smov [#allocation5]  }
   0x3   :  { %s17_s13 = sshll.u32 %s294_s12, 4  ;;  %s26_s15 = sshll.u32 %s295_s14, 4  ;;  %s18_s13 = int_to_ptr.vmem [resolvable:$true] %s17_s13  ;;  %s27_s15 = int_to_ptr.vmem [resolvable:$true] %s26_s15 }
   0x4   :  { %s236_s16 = scalar_lea.vmem %s18_s13, 128  ;;  %p241_p1 = scmp.lt.s32.totalorder %s18_s13, %s18_s13 }
   0x5   :  { %p237_p0 = scmp.ne.s32.totalorder %s18_s13, %s236_s16  ;;  %p242_p2 = scmp.lt.s32.totalorder %s236_s16, %s236_s16 }
   0x7   :  { %p243_p3 = por %p242_p2, %p241_p1 }
   0x9   :  { %p244_p4 = pnand %p243_p3, %p237_p0 }
   0xb   :  { %247 = shalt.err (!%p244_p4)
}
   0xc   :  { %20 = dma.hbm_to_vmem [thread:$0]  %s333_s0, 128, %s18_s13, [#allocation3]  }
   0xd   :  { %s256_s19 = scalar_lea.vmem %s27_s15, 2048  ;;  %p261_p6 = scmp.lt.s32.totalorder %s27_s15, %s27_s15 }
   0xe   :  { %p257_p5 = scmp.ne.s32.totalorder %s27_s15, %s256_s19  ;;  %p262_p7 = scmp.lt.s32.totalorder %s256_s19, %s256_s19 }
  0x10   :  { %p263_p8 = por %p262_p7, %p261_p6 }
  0x12   :  { %p264_p9 = pnand %p263_p8, %p257_p5 }
  0x14   :  { %267 = shalt.err (!%p264_p9)
}
  0x15   :  { %s296_s20 = smov 128   ;;  %s297_s21 = smov 8  }
  0x16   :  { %32 = dma.hbm_to_vmem [thread:$0]  %s334_s1, 2048, %s27_s15, [#allocation6], %s296_s20, %s296_s20, %s297_s21  }
  0x17   :  { %288 = dma.done.wait [#allocation3], 128  }
  0x18   :  { %289 = vsyncadd [#allocation3], 4294967168 }
  0x19   :  { %290 = dma.done.wait [#allocation6], 2048  }
  0x1a   :  { %291 = vsyncadd [#allocation6], 4294965248  ;;  %v298_v0 = vmov 0.0   ;;  %vm299_vm0 = vmmov 0   ;;  %v63_v1 = vld [vmem:[#allocation5 + $0x78] sm:$0xff]  ;;  %v62_v2 = vld [vmem:[#allocation5 + $0x70] sm:$0xff] }
  0x1b   :  { %184 = vmatprep.subr.mxu0 %v298_v0  ;;  %216 = vmatprep.mubr.msk.f32.mxu0 %vm299_vm0, %v298_v0  ;;  %v61_v3 = vld [vmem:[#allocation5 + $0x68] sm:$0xff]  ;;  %v60_v4 = vld [vmem:[#allocation5 + $0x60] sm:$0xff]  ;;  %v59_v5 = vld [vmem:[#allocation5 + $0x58] sm:$0xff]  ;;  %s300_s24 = smov [#allocation7]  }
  0x1c   :  { %185 = vmatpush3.msra.mxu0 %v63_v1  ;;  %v58_v6 = vld [vmem:[#allocation5 + $0x50] sm:$0xff]  ;;  %v57_v7 = vld [vmem:[#allocation5 + $0x48] sm:$0xff]  ;;  %v56_v8 = vld [vmem:[#allocation5 + $0x40] sm:$0xff]  ;;  %s156_s25 = sshll.u32 %s300_s24, 4  ;;  %s157_s25 = int_to_ptr.vmem [resolvable:$true] %s156_s25 }
  0x1d   :  { %186 = vmatprep.subr.mxu0 %v298_v0  ;;  %v55_v9 = vld [vmem:[#allocation5 + $0x38] sm:$0xff]  ;;  %v54_v10 = vld [vmem:[#allocation5 + $0x30] sm:$0xff]  ;;  %v53_v11 = vld [vmem:[#allocation5 + $0x28] sm:$0xff]  ;;  %s268_s26 = scalar_lea.vmem %s157_s25, 128  ;;  %p273_p11 = scmp.lt.s32.totalorder %s157_s25, %s157_s25 }
  0x1e   :  { %187 = vmatpush3.msra.mxu0 %v62_v2  ;;  %v52_v12 = vld [vmem:[#allocation5 + $0x20] sm:$0xff]  ;;  %v51_v13 = vld [vmem:[#allocation5 + $0x18] sm:$0xff]  ;;  %v50_v14 = vld [vmem:[#allocation5 + $0x10] sm:$0xff]  ;;  %p269_p10 = scmp.ne.s32.totalorder %s157_s25, %s268_s26  ;;  %p274_p12 = scmp.lt.s32.totalorder %s268_s26, %s268_s26 }
  0x1f   :  { %188 = vmatprep.subr.mxu0 %v298_v0  ;;  %v49_v15 = vld [vmem:[#allocation5 + $0x8] sm:$0xff]  ;;  %v48_v16 = vld [vmem:[#allocation5] sm:$0xff]  ;;  %v47_v17 = vld [vmem:[#allocation2] sm:$0xff] }
  0x20   :  { %189 = vmatpush3.msra.mxu0 %v61_v3  ;;  %v166_v19 = vld [vmem:[%s335_s2] ss:$0 sm:$0xff]  ;;  %p275_p13 = por %p274_p12, %p273_p11 }
  0x21   :  { %190 = vmatprep.subr.mxu0 %v298_v0 }
  0x22   :  { %191 = vmatpush3.msra.mxu0 %v60_v4  ;;  %p276_p0 = pnand %p275_p13, %p269_p10 }
  0x23   :  { %192 = vmatprep.subr.mxu0 %v298_v0 }
  0x24   :  { %193 = vmatpush3.msra.mxu0 %v59_v5 }
  0x25   :  { %194 = vmatprep.subr.mxu0 %v298_v0 }
  0x26   :  { %195 = vmatpush3.msra.mxu0 %v58_v6 }
  0x27   :  { %196 = vmatprep.subr.mxu0 %v298_v0 }
  0x28   :  { %197 = vmatpush3.msra.mxu0 %v57_v7 }
  0x29   :  { %198 = vmatprep.subr.mxu0 %v298_v0 }
  0x2a   :  { %199 = vmatpush3.msra.mxu0 %v56_v8 }
  0x2b   :  { %200 = vmatprep.subr.mxu0 %v298_v0 }
  0x2c   :  { %201 = vmatpush3.msra.mxu0 %v55_v9 }
  0x2d   :  { %202 = vmatprep.subr.mxu0 %v298_v0 }
  0x2e   :  { %203 = vmatpush3.msra.mxu0 %v54_v10 }
  0x2f   :  { %204 = vmatprep.subr.mxu0 %v298_v0 }
  0x30   :  { %205 = vmatpush3.msra.mxu0 %v53_v11 }
  0x31   :  { %206 = vmatprep.subr.mxu0 %v298_v0 }
  0x32   :  { %207 = vmatpush3.msra.mxu0 %v52_v12 }
  0x33   :  { %208 = vmatprep.subr.mxu0 %v298_v0 }
  0x34   :  { %209 = vmatpush3.msra.mxu0 %v51_v13 }
  0x35   :  { %210 = vmatprep.subr.mxu0 %v298_v0 }
  0x36   :  { %211 = vmatpush3.msra.mxu0 %v50_v14 }
  0x37   :  { %212 = vmatprep.subr.mxu0 %v298_v0 }
  0x38   :  { %213 = vmatpush3.msra.mxu0 %v49_v15 }
  0x39   :  { %214 = vmatprep.subr.mxu0 %v298_v0 }
  0x3a   :  { %215 = vmatpush3.msra.mxu0 %v48_v16 }
  0x3b   :  { %217 = vmatmul.mubr.f32.vlgmr.msra.gmra.mxu0 %v47_v17 }
  0xfb   :  { %v130_v18 = vpop.f32.mrf.mxu0 }
  0xfc   :  { %v147_v21 = vadd.f32 %v166_v19, %v130_v18 }
  0xfd   :  { %v218_v20 = vpop.f32.mrf.mxu0 }
  0xfe   :  { %226 = vtanh.f32 %v147_v21 }
 0x10b   :  { %v227_v22 = vpop.eup %226 }
 0x10c   :  { %149 = vst [vmem:[#allocation7] sm:$0xff] %v227_v22 }
 0x10d   :  { %279 = shalt.err (!%p276_p0)
}
 0x10e   :  { %159 = dma.vmem_to_hbm [thread:$0]  %s157_s25, 128, %s336_s3, [#allocation4]  }
 0x10f   :  { %292 = dma.done.wait [#allocation4], 128  }
 0x110   :  { %293 = vsyncadd [#allocation4], 4294967168 }
 0x111   :  { %163 = vsyncpa [#allocation3], 1 }
 0x112   :  { %164 = vsyncpa [#allocation6], 1 }
 0x113   :  { %165 = vsyncpa [#allocation4], 1 }

</bundles_post_ra>
